<compile_context>
chip_gen: v6e
topology: v6e:2x2x1
jax: 0.10.0
libtpu: 0.0.40
codegen_flags: <defaults>
</compile_context>

<pallas_src>
import jax
import jax.numpy as jnp
from jax.experimental import pallas as pl
from jax.experimental.pallas import tpu as pltpu

HID = 512  # hidden dim 400 zero-padded up to 4 * 128 lanes


def _cdiv(a, b):
    return -(-a // b)


def _round_up(x, m):
    return _cdiv(x, m) * m


def mlp_logsoftmax_kernel(x_ref, w1_ref, b1_ref, w2_ref, b2_ref, w3d_ref, b3d_ref, o_ref):
    # layer1 + ReLU  (bf16 MXU inputs, f32 accumulation)
    x = x_ref[...]                                                        # (TB, 20) bf16
    h1 = jnp.dot(x, w1_ref[...], preferred_element_type=jnp.float32) + b1_ref[...]
    h1 = jnp.maximum(h1, 0.0).astype(jnp.bfloat16)                        # (TB, 512)

    # layer3 + ReLU
    h2 = jnp.dot(h1, w2_ref[...], preferred_element_type=jnp.float32) + b2_ref[...]
    h2 = jnp.maximum(h2, 0.0)                                             # (TB, 512) f32

    # layer5 + layer6 head, off the MXU:
    #   d = z1 - z0 = sum(h2 * (w3[:,1]-w3[:,0])) + (b3[1]-b3[0])   (VPU mul + XLU reduce)
    #   log p0 = -softplus(d) ; log p1 = d - softplus(d)
    d = jnp.sum(h2 * w3d_ref[...], axis=-1, keepdims=True) + b3d_ref[...]  # (TB, 1)
    sp = jnp.maximum(d, 0.0) + jnp.log1p(jnp.exp(-jnp.abs(d)))             # stable softplus(d)

    col = jax.lax.broadcasted_iota(jnp.int32, (d.shape[0], 2), dimension=1)
    out = jnp.where(col == 0, -sp, d - sp)                                 # (TB, 2)
    o_ref[...] = out.astype(o_ref.dtype)


def pack_params(w1, b1, w2, b2, w3, b3):
    """PyTorch-layout params (w: (out,in), b: (out,)) -> kernel layout.

    Transposes to (in, out), zero-pads hidden dim 400 -> 512, stores the two
    big weight matrices in bf16, and collapses the 2-class head into a single
    difference ROW (shape (1, HID)) kept in f32 for the VPU/XLU head.
    """
    hid = w1.shape[0]              # 400
    pad = HID - hid
    w1p = jnp.pad(w1.T, ((0, 0), (0, pad))).astype(jnp.bfloat16)          # (20, 512)
    b1p = jnp.pad(b1, (0, pad)).reshape(1, HID).astype(jnp.float32)       # (1, 512)
    w2p = jnp.pad(w2.T, ((0, pad), (0, pad))).astype(jnp.bfloat16)        # (512, 512)
    b2p = jnp.pad(b2, (0, pad)).reshape(1, HID).astype(jnp.float32)       # (1, 512)
    w3d = jnp.pad(w3[1] - w3[0], (0, pad)).reshape(1, HID).astype(jnp.float32)  # (1, 512)
    b3d = (b3[1] - b3[0]).reshape(1, 1).astype(jnp.float32)               # (1, 1)
    return w1p, b1p, w2p, b2p, w3d, b3d


def _choose_tile(B, block_b):
    """Balanced batch tile: minimize padding, keep >=2 grid steps when B >= 16
    so ('parallel',) batch axis can shard across v7x's 2 TensorCores."""
    n_steps = _cdiv(B, block_b)
    if n_steps == 1 and B >= 16:
        n_steps = 2
    tb = _round_up(_cdiv(B, n_steps), 8)
    return tb, tb * n_steps


def dnn_action_detect_forward(x, params, *, block_b=2048):
    """x: (B, 20) float32. params: output of pack_params(). Returns (B, 2) f32 log-probs."""
    w1, b1, w2, b2, w3d, b3d = params
    B, F = x.shape

    tb, bp = _choose_tile(B, block_b)
    x = x.astype(jnp.bfloat16)
    if bp != B:
        x = jnp.pad(x, ((0, bp - B), (0, 0)))

    const_spec = lambda shape: pl.BlockSpec(shape, lambda i: (0, 0))      # resident weights

    out = pl.pallas_call(
        mlp_logsoftmax_kernel,
        out_shape=jax.ShapeDtypeStruct((bp, 2), jnp.float32),
        grid=(bp // tb,),
        in_specs=[
            pl.BlockSpec((tb, F), lambda i: (i, 0)),
            const_spec(w1.shape), const_spec(b1.shape),
            const_spec(w2.shape), const_spec(b2.shape),
            const_spec(w3d.shape), const_spec(b3d.shape),
        ],
        out_specs=pl.BlockSpec((tb, 2), lambda i: (i, 0)),
        compiler_params=pltpu.CompilerParams(
            dimension_semantics=("parallel",),
            vmem_limit_bytes=32 * 1024 * 1024,
        ),
    )(x, w1, b1, w2, b2, w3d, b3d)
    return out[:B]


def init_params(key):
    """PyTorch nn.Linear default init (uniform +/- 1/sqrt(fan_in)), torch layout."""
    def linear(k, fan_in, fan_out):
        kw, kb = jax.random.split(k)
        bound = 1.0 / jnp.sqrt(jnp.float32(fan_in))
        w = jax.random.uniform(kw, (fan_out, fan_in), jnp.float32, -bound, bound)
        b = jax.random.uniform(kb, (fan_out,), jnp.float32, -bound, bound)
        return w, b

    k1, k2, k3 = jax.random.split(key, 3)
    w1, b1 = linear(k1, 20, 400)
    w2, b2 = linear(k2, 400, 400)
    w3, b3 = linear(k3, 400, 2)
    return w1, b1, w2, b2, w3, b3


if __name__ == "__main__":
    key = jax.random.PRNGKey(0)
    kx, kp = jax.random.split(key)

    B = 8  # small demo batch; wrapper also handles ragged / large B via balanced tiles
    x = jax.random.normal(kx, (B, 20), dtype=jnp.float32)

    torch_layout = init_params(kp)
    params = pack_params(*torch_layout)

    out = dnn_action_detect_forward(x, params)
    out = jax.block_until_ready(out)

    # Pure-JAX reference using the SAME bf16 weights / f32 accumulation path for the
    # two big layers, and the standard f32 log_softmax head (full w3) for cross-check.
    w1, b1, w2, b2, _, _ = params
    w3_t, b3_t = torch_layout[4], torch_layout[5]
    w3p = jnp.pad(w3_t.T, ((0, HID - 400), (0, 0))).astype(jnp.float32)   # (512, 2)
    h1 = jnp.maximum(
        jnp.dot(x.astype(jnp.bfloat16), w1, preferred_element_type=jnp.float32) + b1, 0.0)
    h2 = jnp.maximum(
        jnp.dot(h1.astype(jnp.bfloat16), w2, preferred_element_type=jnp.float32) + b2, 0.0)
    logits = h2 @ w3p + b3_t.reshape(1, 2)
    ref = jax.nn.log_softmax(logits, axis=1)

    assert out.shape == (B, 2)
    assert jnp.allclose(out, ref, atol=1e-3, rtol=1e-3), (
        f"mismatch vs JAX reference, max abs diff = {jnp.max(jnp.abs(out - ref))}")

    print("KERNEL_OK")
</pallas_src>

<mosaic_0001>
module attributes {stable_mosaic.version = 11 : i64} {
  func.func @mlp_logsoftmax_kernel(%arg0: i32, %arg1: memref<8x20xbf16, #tpu.memory_space<vmem>>, %arg2: memref<20x512xbf16, #tpu.memory_space<vmem>>, %arg3: memref<1x512xf32, #tpu.memory_space<vmem>>, %arg4: memref<512x512xbf16, #tpu.memory_space<vmem>>, %arg5: memref<1x512xf32, #tpu.memory_space<vmem>>, %arg6: memref<1x512xf32, #tpu.memory_space<vmem>>, %arg7: memref<1x1xf32, #tpu.memory_space<vmem>>, %arg8: memref<8x2xf32, #tpu.memory_space<vmem>>) attributes {dimension_semantics = [#tpu.dimension_semantics<parallel>], iteration_bounds = array<i64: 1>, scalar_prefetch = 0 : i64, scratch_operands = 0 : i64, tpu.core_type = #tpu.core_type<tc>, window_params = [{transform_indices = @transform_0, window_bounds = array<i64: 8, 20>}, {pipeline_mode = #tpu.pipeline_mode<synchronous>, transform_indices = @transform_1, window_bounds = array<i64: 20, 512>}, {pipeline_mode = #tpu.pipeline_mode<synchronous>, transform_indices = @transform_2, window_bounds = array<i64: 1, 512>}, {pipeline_mode = #tpu.pipeline_mode<synchronous>, transform_indices = @transform_3, window_bounds = array<i64: 512, 512>}, {pipeline_mode = #tpu.pipeline_mode<synchronous>, transform_indices = @transform_4, window_bounds = array<i64: 1, 512>}, {pipeline_mode = #tpu.pipeline_mode<synchronous>, transform_indices = @transform_5, window_bounds = array<i64: 1, 512>}, {pipeline_mode = #tpu.pipeline_mode<synchronous>, transform_indices = @transform_6, window_bounds = array<i64: 1, 1>}, {transform_indices = @transform_7, window_bounds = array<i64: 8, 2>}]} {
    %c0 = arith.constant 0 : index
    %c0_0 = arith.constant 0 : index
    %0 = vector.load %arg1[%c0, %c0_0] : memref<8x20xbf16, #tpu.memory_space<vmem>>, vector<8x20xbf16>
    %c0_1 = arith.constant 0 : index
    %c0_2 = arith.constant 0 : index
    %1 = vector.load %arg2[%c0_1, %c0_2] : memref<20x512xbf16, #tpu.memory_space<vmem>>, vector<20x512xbf16>
    %cst = arith.constant dense<0.000000e+00> : vector<8x512xf32>
    %2 = tpu.matmul %0, %1, %cst {dimension_numbers = #tpu.dot_dimension_numbers<[1], [0], [0], [1], [0, 0, 1, 1], [], []>} : vector<8x20xbf16>, vector<20x512xbf16>, vector<8x512xf32> -> vector<8x512xf32>
    %c0_3 = arith.constant 0 : index
    %c0_4 = arith.constant 0 : index
    %3 = vector.load %arg3[%c0_3, %c0_4] : memref<1x512xf32, #tpu.memory_space<vmem>>, vector<1x512xf32>
    %4 = vector.broadcast %3 : vector<1x512xf32> to vector<8x512xf32>
    %5 = arith.addf %2, %4 : vector<8x512xf32>
    %cst_5 = arith.constant 0.000000e+00 : f32
    %6 = vector.broadcast %cst_5 : f32 to vector<8x512xf32>
    %7 = arith.maximumf %5, %6 : vector<8x512xf32>
    %8 = arith.truncf %7 : vector<8x512xf32> to vector<8x512xbf16>
    %c0_6 = arith.constant 0 : index
    %c0_7 = arith.constant 0 : index
    %9 = vector.load %arg4[%c0_6, %c0_7] : memref<512x512xbf16, #tpu.memory_space<vmem>>, vector<512x512xbf16>
    %cst_8 = arith.constant dense<0.000000e+00> : vector<8x512xf32>
    %10 = tpu.matmul %8, %9, %cst_8 {dimension_numbers = #tpu.dot_dimension_numbers<[1], [0], [0], [1], [0, 0, 1, 1], [], []>} : vector<8x512xbf16>, vector<512x512xbf16>, vector<8x512xf32> -> vector<8x512xf32>
    %c0_9 = arith.constant 0 : index
    %c0_10 = arith.constant 0 : index
    %11 = vector.load %arg5[%c0_9, %c0_10] : memref<1x512xf32, #tpu.memory_space<vmem>>, vector<1x512xf32>
    %12 = vector.broadcast %11 : vector<1x512xf32> to vector<8x512xf32>
    %13 = arith.addf %10, %12 : vector<8x512xf32>
    %cst_11 = arith.constant 0.000000e+00 : f32
    %14 = vector.broadcast %cst_11 : f32 to vector<8x512xf32>
    %15 = arith.maximumf %13, %14 : vector<8x512xf32>
    %c0_12 = arith.constant 0 : index
    %c0_13 = arith.constant 0 : index
    %16 = vector.load %arg6[%c0_12, %c0_13] : memref<1x512xf32, #tpu.memory_space<vmem>>, vector<1x512xf32>
    %17 = vector.broadcast %16 : vector<1x512xf32> to vector<8x512xf32>
    %18 = arith.mulf %15, %17 : vector<8x512xf32>
    %cst_14 = arith.constant dense<0.000000e+00> : vector<8xf32>
    %19 = vector.multi_reduction <add>, %18, %cst_14 [1] : vector<8x512xf32> to vector<8xf32>
    %20 = vector.shape_cast %19 : vector<8xf32> to vector<8x1xf32>
    %c0_15 = arith.constant 0 : index
    %c0_16 = arith.constant 0 : index
    %21 = vector.load %arg7[%c0_15, %c0_16] : memref<1x1xf32, #tpu.memory_space<vmem>>, vector<1x1xf32>
    %22 = vector.broadcast %21 : vector<1x1xf32> to vector<8x1xf32>
    %23 = arith.addf %20, %22 : vector<8x1xf32>
    %cst_17 = arith.constant 0.000000e+00 : f32
    %24 = vector.broadcast %cst_17 : f32 to vector<8x1xf32>
    %25 = arith.maximumf %23, %24 : vector<8x1xf32>
    %26 = math.absf %23 : vector<8x1xf32>
    %cst_18 = arith.constant 0.000000e+00 : f32
    %27 = vector.broadcast %cst_18 : f32 to vector<8x1xf32>
    %28 = arith.subf %27, %26 : vector<8x1xf32>
    %29 = math.exp %28 : vector<8x1xf32>
    %30 = math.log1p %29 : vector<8x1xf32>
    %31 = arith.addf %25, %30 : vector<8x1xf32>
    %32 = tpu.iota {dimensions = array<i32: 1>} : vector<8x2xi32>
    %c0_i32 = arith.constant 0 : i32
    %33 = vector.broadcast %c0_i32 : i32 to vector<8x2xi32>
    %34 = arith.cmpi eq, %32, %33 : vector<8x2xi32>
    %cst_19 = arith.constant 0.000000e+00 : f32
    %35 = vector.broadcast %cst_19 : f32 to vector<8x1xf32>
    %36 = arith.subf %35, %31 : vector<8x1xf32>
    %37 = arith.subf %23, %31 : vector<8x1xf32>
    %38 = vector.shape_cast %36 : vector<8x1xf32> to vector<8x1xf32>
    %39 = vector.broadcast %38 : vector<8x1xf32> to vector<8x2xf32>
    %40 = vector.shape_cast %37 : vector<8x1xf32> to vector<8x1xf32>
    %41 = vector.broadcast %40 : vector<8x1xf32> to vector<8x2xf32>
    %42 = arith.select %34, %39, %41 : vector<8x2xi1>, vector<8x2xf32>
    %c0_20 = arith.constant 0 : index
    %c0_21 = arith.constant 0 : index
    %43 = vector.load %arg8[%c0_20, %c0_21] : memref<8x2xf32, #tpu.memory_space<vmem>>, vector<8x2xf32>
    tpu.vector_store %arg8[%c0_20, %c0_21], %42 {strides = array<i32>} : memref<8x2xf32, #tpu.memory_space<vmem>>, vector<8x2xf32>,
    return
  }
  func.func @transform_0(%arg0: i32) -> (i32, i32) {
    %c0_i32 = arith.constant 0 : i32
    %c0_i32_0 = arith.constant 0 : i32
    return %arg0, %c0_i32 : i32, i32
  }
  func.func @transform_1(%arg0: i32) -> (i32, i32) {
    %c0_i32 = arith.constant 0 : i32
    %c0_i32_0 = arith.constant 0 : i32
    %c0_i32_1 = arith.constant 0 : i32
    return %c0_i32, %c0_i32_0 : i32, i32
  }
  func.func @transform_2(%arg0: i32) -> (i32, i32) {
    %c0_i32 = arith.constant 0 : i32
    %c0_i32_0 = arith.constant 0 : i32
    %c0_i32_1 = arith.constant 0 : i32
    return %c0_i32, %c0_i32_0 : i32, i32
  }
  func.func @transform_3(%arg0: i32) -> (i32, i32) {
    %c0_i32 = arith.constant 0 : i32
    %c0_i32_0 = arith.constant 0 : i32
    %c0_i32_1 = arith.constant 0 : i32
    return %c0_i32, %c0_i32_0 : i32, i32
  }
  func.func @transform_4(%arg0: i32) -> (i32, i32) {
    %c0_i32 = arith.constant 0 : i32
    %c0_i32_0 = arith.constant 0 : i32
    %c0_i32_1 = arith.constant 0 : i32
    return %c0_i32, %c0_i32_0 : i32, i32
  }
  func.func @transform_5(%arg0: i32) -> (i32, i32) {
    %c0_i32 = arith.constant 0 : i32
    %c0_i32_0 = arith.constant 0 : i32
    %c0_i32_1 = arith.constant 0 : i32
    return %c0_i32, %c0_i32_0 : i32, i32
  }
  func.func @transform_6(%arg0: i32) -> (i32, i32) {
    %c0_i32 = arith.constant 0 : i32
    %c0_i32_0 = arith.constant 0 : i32
    %c0_i32_1 = arith.constant 0 : i32
    return %c0_i32, %c0_i32_0 : i32, i32
  }
  func.func @transform_7(%arg0: i32) -> (i32, i32) {
    %c0_i32 = arith.constant 0 : i32
    %c0_i32_0 = arith.constant 0 : i32
    return %arg0, %c0_i32 : i32, i32
  }
}

</mosaic_0001>

<bundles_post_ra>
// kernel: tpu_custom_call.1
= control target key start
LH: loop header
LB: loop body
LE: loop exit
PB: predicated region body
PF: predicated region fallthrough
CT: control target
= control target key end

     0   :  { %s1826_s0 = inlined_call_operand.hbm [shape: bf16[8,20], index: 0, kind: input, shape index: {}]   ;;  %s1827_s1 = inlined_call_operand.hbm [shape: bf16[20,512], index: 1, kind: input, shape index: {}]   ;;  %s1828_s2 = inlined_call_operand.vmem [shape: f32[1,512], index: 2, kind: input, shape index: {}]   ;;  %s1829_s3 = inlined_call_operand.hbm [shape: bf16[512,512], index: 3, kind: input, shape index: {}]   ;;  %s1830_s4 = inlined_call_operand.vmem [shape: f32[1,512], index: 4, kind: input, shape index: {}]   ;;  %s1831_s5 = inlined_call_operand.hbm [shape: f32[1,512], index: 5, kind: input, shape index: {}]   ;;  %s1832_s6 = inlined_call_operand.<no memory space> [shape: f32[1,1], index: 6, kind: input, shape index: {}]   ;;  %s1833_s7 = inlined_call_operand.vmem [shape: f32[8,2], index: 7, kind: output, shape index: {}]  }
   0x1   :  { %v12_v0 = vstv %s1832_s6 }
   0x2   :  { %13 = vst [vmem:[#allocation2] sm:$0x1] %v12_v0 }
   0x3   :  { %14 = vsyncpa [#allocation4], 0 }
   0x4   :  { %15 = vsyncpa [#allocation6], 0 }
   0x5   :  { %16 = vsyncpa [#allocation9], 0  ;;  %s1725_s26 = smov [#allocation5]  }
   0x6   :  { %s32_s27 = sshll.u32 %s1725_s26, 4  ;;  %s33_s27 = int_to_ptr.vmem [resolvable:$true] %s32_s27 }
   0x7   :  { %s1647_s28 = scalar_lea.vmem %s33_s27, 768  ;;  %p1652_p1 = scmp.lt.s32.totalorder %s33_s27, %s33_s27 }
   0x8   :  { %p1648_p0 = scmp.ne.s32.totalorder %s33_s27, %s1647_s28  ;;  %p1653_p2 = scmp.lt.s32.totalorder %s1647_s28, %s1647_s28 }
   0xa   :  { %p1654_p3 = por %p1653_p2, %p1652_p1 }
   0xc   :  { %p1655_p4 = pnand %p1654_p3, %p1648_p0 }
   0xe   :  { %1658 = shalt.err (!%p1655_p4)
}
   0xf   :  { %s1726_s29 = smov 256   ;;  %s1727_s30 = smov 16  }
  0x10   :  { %38 = dma.hbm_to_vmem [thread:$0]  %s1827_s1, 768, %s33_s27, [#allocation6], %s1726_s29, %s1726_s29, %s1727_s30  }
  0x11   :  { %s1728_s6 = smov [#allocation3]   ;;  %s1729_s11 = smov [#allocation7]  }
  0x12   :  { %s23_s10 = sshll.u32 %s1728_s6, 4  ;;  %s46_s12 = sshll.u32 %s1729_s11, 4  ;;  %s24_s10 = int_to_ptr.vmem [resolvable:$true] %s23_s10  ;;  %s47_s12 = int_to_ptr.vmem [resolvable:$true] %s46_s12 }
  0x13   :  { %s1667_s13 = scalar_lea.vmem %s24_s10, 64  ;;  %p1672_p6 = scmp.lt.s32.totalorder %s24_s10, %s24_s10 }
  0x14   :  { %p1668_p5 = scmp.ne.s32.totalorder %s24_s10, %s1667_s13  ;;  %p1673_p7 = scmp.lt.s32.totalorder %s1667_s13, %s1667_s13 }
  0x16   :  { %p1674_p8 = por %p1673_p7, %p1672_p6 }
  0x18   :  { %p1675_p9 = pnand %p1674_p8, %p1668_p5 }
  0x1a   :  { %1678 = shalt.err (!%p1675_p9)
}
  0x1b   :  { %26 = dma.hbm_to_vmem [thread:$0]  %s1826_s0, 64, %s24_s10, [#allocation4]  }
  0x1c   :  { %s1687_s16 = scalar_lea.vmem %s47_s12, 16384  ;;  %p1692_p11 = scmp.lt.s32.totalorder %s47_s12, %s47_s12 }
  0x1d   :  { %p1688_p10 = scmp.ne.s32.totalorder %s47_s12, %s1687_s16  ;;  %p1693_p12 = scmp.lt.s32.totalorder %s1687_s16, %s1687_s16 }
  0x1f   :  { %p1694_p13 = por %p1693_p12, %p1692_p11 }
  0x21   :  { %p1695_p0 = pnand %p1694_p13, %p1688_p10 }
  0x23   :  { %1698 = shalt.err (!%p1695_p0)
}
  0x24   :  { %52 = dma.hbm_to_vmem [thread:$0]  %s1829_s3, 16384, %s47_s12, [#allocation6], %s1726_s29, %s1726_s29, %s1727_s30  }
  0x25   :  { %s1730_s18 = smov [#allocation8]  }
  0x26   :  { %s61_s19 = sshll.u32 %s1730_s18, 4  ;;  %s62_s19 = int_to_ptr.vmem [resolvable:$true] %s61_s19 }
  0x27   :  { %s1707_s20 = scalar_lea.vmem %s62_s19, 64  ;;  %p1712_p2 = scmp.lt.s32.totalorder %s62_s19, %s62_s19 }
  0x28   :  { %p1708_p1 = scmp.ne.s32.totalorder %s62_s19, %s1707_s20  ;;  %p1713_p3 = scmp.lt.s32.totalorder %s1707_s20, %s1707_s20 }
  0x2a   :  { %p1714_p4 = por %p1713_p3, %p1712_p2 }
  0x2c   :  { %p1715_p5 = pnand %p1714_p4, %p1708_p1 }
  0x2e   :  { %1718 = shalt.err (!%p1715_p5)
}
  0x2f   :  { %64 = dma.hbm_to_vmem [thread:$0]  %s1831_s5, 64, %s62_s19, [#allocation9]  }
  0x30   :  { %1719 = dma.done.wait [#allocation4], 64  }
  0x31   :  { %1720 = vsyncadd [#allocation4], 4294967232 }
  0x32   :  { %1721 = dma.done.wait [#allocation6], 17152  }
  0x33   :  { %1722 = vsyncadd [#allocation6], 4294950144 }
  0x34   :  { %1723 = dma.done.wait [#allocation9], 64  }
  0x35   :  { %1724 = vsyncadd [#allocation9], 4294967232  ;;  %v1731_v1 = vmov 0   ;;  %v85_v2 = vld [vmem:[#allocation5 + $0x20] sm:$0x33]  ;;  %vm143_vm0 = vcmask 1041408  }
  0x36   :  { %188 = vmatprep.mubr.bf16.mxu0 %v1731_v1  ;;  %229 = vmatprep.mubr.bf16.mxu1 %v1731_v1  ;;  %v86_v3 = vld [vmem:[#allocation5 + $0x28] sm:$0x33]  ;;  %v1288_v4 = vcombine.high %v85_v2, %v85_v2  ;;  %v1287_v6 = vcombine.low %v85_v2, %v85_v2  ;;  %v1437_v8 = vld [vmem:[#allocation5 + $0x4] ss:$16 sps:$4 sm:$0xff]   ;;  %v1441_v12 = vld [vmem:[#allocation5] ss:$16 sps:$4 sm:$0xff]  }
  0x37   :  { %1432 = vset.pattern.permute.xlu1 %v1731_v1  ;;  %1431 = vset.pattern.permute.xlu0 %v1731_v1  ;;  %v1290_v5 = vcombine.high %v86_v3, %v86_v3  ;;  %v1289_v7 = vcombine.low %v86_v3, %v86_v3  ;;  %v1439_v9 = vld [vmem:[#allocation5 + $0xc] ss:$16 sps:$4 sm:$0xff]   ;;  %v1442_v13 = vld [vmem:[#allocation5 + $0x8] ss:$16 sps:$4 sm:$0xff]   ;;  %v1445_v14 = vld [vmem:[#allocation7 + $0xe4] ss:$16 sps:$4 sm:$0xff]  }
  0x38   :  { %1291 = vmatprep.subr.msk.bf16.mxu0 %vm143_vm0, %v1288_v4  ;;  %v145_v10 = vsel %vm143_vm0, %v1287_v6, 0  ;;  %v80_v15 = vld [vmem:[#allocation3] sm:$0xf]  ;;  %v1448_v16 = vld [vmem:[#allocation7 + $0x2e4] ss:$16 sps:$4 sm:$0xff]   ;;  %vm139_vm1 = vcmask 162816  }
  0x39   :  { %1293 = vmatprep.subr.msk.bf16.mxu1 %vm143_vm0, %v1290_v5  ;;  %v151_v11 = vsel %vm143_vm0, %v1289_v7, 0  ;;  %169 = vmatpush1.bf16.msra.mxu0 %v145_v10  ;;  %v1443_v17 = vld [vmem:[#allocation7 + $0xe0] ss:$16 sps:$4 sm:$0xff]   ;;  %v1451_v19 = vld [vmem:[#allocation7 + $0xc4] ss:$16 sps:$4 sm:$0xff]   ;;  %vm1274_vm4 = vcmask 15360  }
  0x3a   :  { %210 = vmatpush1.bf16.msra.mxu1 %v151_v11  ;;  %170 = vmatprep.subr.bf16.mxu0 %v1437_v8  ;;  %v1446_v18 = vld [vmem:[#allocation7 + $0x2e0] ss:$16 sps:$4 sm:$0xff]   ;;  %v1454_v20 = vld [vmem:[#allocation7 + $0x2c4] ss:$16 sps:$4 sm:$0xff]  }
  0x3b   :  { %211 = vmatprep.subr.bf16.mxu1 %v1439_v9  ;;  %v1449_v21 = vld [vmem:[#allocation7 + $0xc0] ss:$16 sps:$4 sm:$0xff]   ;;  %v1457_v23 = vld [vmem:[#allocation7 + $0xa4] ss:$16 sps:$4 sm:$0xff]  }
  0x3c   :  { %v1452_v22 = vld [vmem:[#allocation7 + $0x2c0] ss:$16 sps:$4 sm:$0xff]   ;;  %v1460_v24 = vld [vmem:[#allocation7 + $0x2a4] ss:$16 sps:$4 sm:$0xff]  }
  0x3d   :  { %171 = vmatpush1.bf16.msra.mxu0 %v1441_v12  ;;  %v1455_v25 = vld [vmem:[#allocation7 + $0xa0] ss:$16 sps:$4 sm:$0xff]   ;;  %v1463_v27 = vld [vmem:[#allocation7 + $0x84] ss:$16 sps:$4 sm:$0xff]  }
  0x3e   :  { %212 = vmatpush1.bf16.msra.mxu1 %v1442_v13  ;;  %1036 = vmatprep.subr.bf16.mxu0 %v1445_v14  ;;  %v1458_v26 = vld [vmem:[#allocation7 + $0x2a0] ss:$16 sps:$4 sm:$0xff]   ;;  %v1466_v28 = vld [vmem:[#allocation7 + $0x284] ss:$16 sps:$4 sm:$0xff]  }
  0x3f   :  { %1077 = vmatprep.subr.bf16.mxu1 %v1448_v16  ;;  %v1461_v29 = vld [vmem:[#allocation7 + $0x80] ss:$16 sps:$4 sm:$0xff]   ;;  %v1469_v31 = vld [vmem:[#allocation7 + $0x64] ss:$16 sps:$4 sm:$0xff]   ;;  %v1544_v16 = vld [vmem:[#allocation7 + $0x2ec] ss:$16 sps:$4 sm:$0xff]  }
  0x40   :  { %1292 = vmatmul.mubr.msk.bf16.vlgmr.msra.gmra.mxu0 %vm139_vm1, %v80_v15  ;;  %v1464_v30 = vld [vmem:[#allocation7 + $0x280] ss:$16 sps:$4 sm:$0xff]   ;;  %v1472_v32 = vld [vmem:[#allocation7 + $0x264] ss:$16 sps:$4 sm:$0xff]  }
  0x41   :  { %1294 = vmatmul.mubr.msk.bf16.vlgmr.msra.gmra.mxu1 %vm139_vm1, %v80_v15  ;;  %1037 = vmatpush1.bf16.msra.mxu0 %v1443_v17  ;;  %v1467_v33 = vld [vmem:[#allocation7 + $0x60] ss:$16 sps:$4 sm:$0xff]   ;;  %v1475_v35 = vld [vmem:[#allocation7 + $0x44] ss:$16 sps:$4 sm:$0xff]   ;;  %v1541_v15 = vld [vmem:[#allocation7 + $0xec] ss:$16 sps:$4 sm:$0xff]   ;;  %v89_v17 = vlaneseq }
  0x42   :  { %1078 = vmatpush1.bf16.msra.mxu1 %v1446_v18  ;;  %1038 = vmatprep.subr.bf16.mxu0 %v1451_v19  ;;  %v1470_v34 = vld [vmem:[#allocation7 + $0x260] ss:$16 sps:$4 sm:$0xff]   ;;  %v1478_v36 = vld [vmem:[#allocation7 + $0x244] ss:$16 sps:$4 sm:$0xff]  }
  0x43   :  { %1079 = vmatprep.subr.bf16.mxu1 %v1454_v20  ;;  %v1473_v37 = vld [vmem:[#allocation7 + $0x40] ss:$16 sps:$4 sm:$0xff]   ;;  %v1481_v39 = vld [vmem:[#allocation7 + $0x24] ss:$16 sps:$4 sm:$0xff]   ;;  %v90_v18 = vshrl.u32 %v89_v17, 7 }
  0x44   :  { %v1476_v38 = vld [vmem:[#allocation7 + $0x240] ss:$16 sps:$4 sm:$0xff]   ;;  %v1484_v40 = vld [vmem:[#allocation7 + $0x224] ss:$16 sps:$4 sm:$0xff]  }
  0x45   :  { %1039 = vmatpush1.bf16.msra.mxu0 %v1449_v21  ;;  %v1479_v41 = vld [vmem:[#allocation7 + $0x20] ss:$16 sps:$4 sm:$0xff]   ;;  %v1487_v43 = vld [vmem:[#allocation7 + $0x4] ss:$16 sps:$4 sm:$0xff]   ;;  %v1788_v19 = vsub.s32 0, %v90_v18  ;;  %v1790_v20 = vsub.s32 2, %v90_v18 }
  0x46   :  { %1080 = vmatpush1.bf16.msra.mxu1 %v1452_v22  ;;  %1040 = vmatprep.subr.bf16.mxu0 %v1457_v23  ;;  %v1482_v42 = vld [vmem:[#allocation7 + $0x220] ss:$16 sps:$4 sm:$0xff]   ;;  %v1490_v44 = vld [vmem:[#allocation7 + $0x204] ss:$16 sps:$4 sm:$0xff]   ;;  %v87_v21 = vld [vmem:[%s1828_s2] sm:$0xf] }
  0x47   :  { %1081 = vmatprep.subr.bf16.mxu1 %v1460_v24  ;;  %v1485_v45 = vld [vmem:[#allocation7] ss:$16 sps:$4 sm:$0xff]   ;;  %v1493_v47 = vld [vmem:[#allocation7 + $0x1e4] ss:$16 sps:$4 sm:$0xff]   ;;  %v1795_v22 = vsub.s32 1, %v90_v18  ;;  %v1797_v23 = vsub.s32 3, %v90_v18  ;;  %v92_v24 = vrot.slane %v87_v21, %v1788_v19 }
  0x48   :  { %v1488_v46 = vld [vmem:[#allocation7 + $0x200] ss:$16 sps:$4 sm:$0xff]   ;;  %v1496_v48 = vld [vmem:[#allocation7 + $0x3e4] ss:$16 sps:$4 sm:$0xff]   ;;  %v1590_v18 = vld [vmem:[#allocation7 + $0x3e8] ss:$16 sps:$4 sm:$0xff]  }
  0x49   :  { %1041 = vmatpush1.bf16.msra.mxu0 %v1455_v25  ;;  %v1491_v49 = vld [vmem:[#allocation7 + $0x1e0] ss:$16 sps:$4 sm:$0xff]   ;;  %v1499_v51 = vld [vmem:[#allocation7 + $0x1c4] ss:$16 sps:$4 sm:$0xff]   ;;  %v100_v25 = vrot.slane %v87_v21, %v1790_v20 }
  0x4a   :  { %1082 = vmatpush1.bf16.msra.mxu1 %v1458_v26  ;;  %1042 = vmatprep.subr.bf16.mxu0 %v1463_v27  ;;  %v1494_v50 = vld [vmem:[#allocation7 + $0x3e0] ss:$16 sps:$4 sm:$0xff]   ;;  %v1502_v52 = vld [vmem:[#allocation7 + $0x3c4] ss:$16 sps:$4 sm:$0xff]   ;;  %v96_v26 = vrot.slane %v87_v21, %v1795_v22  ;;  %v104_v27 = vrot.slane %v87_v21, %v1797_v23  ;;  %v1595_v21 = vld [vmem:[#allocation7 + $0x1cc] ss:$16 sps:$4 sm:$0xff]  }
  0x4b   :  { %1083 = vmatprep.subr.bf16.mxu1 %v1466_v28  ;;  %v1497_v53 = vld [vmem:[#allocation7 + $0x1c0] ss:$16 sps:$4 sm:$0xff]   ;;  %v1505_v55 = vld [vmem:[#allocation7 + $0x1a4] ss:$16 sps:$4 sm:$0xff]  }
  0x4c   :  { %v1500_v54 = vld [vmem:[#allocation7 + $0x3c0] ss:$16 sps:$4 sm:$0xff]   ;;  %v1508_v56 = vld [vmem:[#allocation7 + $0x3a4] ss:$16 sps:$4 sm:$0xff]  }
  0x4d   :  { %1043 = vmatpush1.bf16.msra.mxu0 %v1461_v29  ;;  %v1503_v57 = vld [vmem:[#allocation7 + $0x1a0] ss:$16 sps:$4 sm:$0xff]   ;;  %v1511_v59 = vld [vmem:[#allocation7 + $0x184] ss:$16 sps:$4 sm:$0xff]  }
  0x4e   :  { %1084 = vmatpush1.bf16.msra.mxu1 %v1464_v30  ;;  %1044 = vmatprep.subr.bf16.mxu0 %v1469_v31  ;;  %v1506_v58 = vld [vmem:[#allocation7 + $0x3a0] ss:$16 sps:$4 sm:$0xff]   ;;  %v1514_v60 = vld [vmem:[#allocation7 + $0x384] ss:$16 sps:$4 sm:$0xff]  }
  0x4f   :  { %1085 = vmatprep.subr.bf16.mxu1 %v1472_v32  ;;  %v1509_v61 = vld [vmem:[#allocation7 + $0x180] ss:$16 sps:$4 sm:$0xff]   ;;  %v1517_v63 = vld [vmem:[#allocation7 + $0x164] ss:$16 sps:$4 sm:$0xff]  }
  0x50   :  { %v1512_v62 = vld [vmem:[#allocation7 + $0x380] ss:$16 sps:$4 sm:$0xff]   ;;  %v1520_v0 = vld [vmem:[#allocation7 + $0x364] ss:$16 sps:$4 sm:$0xff]  }
  0x51   :  { %1045 = vmatpush1.bf16.msra.mxu0 %v1467_v33  ;;  %v1515_v1 = vld [vmem:[#allocation7 + $0x160] ss:$16 sps:$4 sm:$0xff]   ;;  %v1523_v3 = vld [vmem:[#allocation7 + $0x144] ss:$16 sps:$4 sm:$0xff]  }
  0x52   :  { %1086 = vmatpush1.bf16.msra.mxu1 %v1470_v34  ;;  %1046 = vmatprep.subr.bf16.mxu0 %v1475_v35  ;;  %v1518_v2 = vld [vmem:[#allocation7 + $0x360] ss:$16 sps:$4 sm:$0xff]   ;;  %v1526_v4 = vld [vmem:[#allocation7 + $0x344] ss:$16 sps:$4 sm:$0xff]  }
  0x53   :  { %1087 = vmatprep.subr.bf16.mxu1 %v1478_v36  ;;  %v1521_v5 = vld [vmem:[#allocation7 + $0x140] ss:$16 sps:$4 sm:$0xff]   ;;  %v1529_v7 = vld [vmem:[#allocation7 + $0x124] ss:$16 sps:$4 sm:$0xff]  }
  0x54   :  { %v1524_v6 = vld [vmem:[#allocation7 + $0x340] ss:$16 sps:$4 sm:$0xff]   ;;  %v1532_v8 = vld [vmem:[#allocation7 + $0x324] ss:$16 sps:$4 sm:$0xff]  }
  0x55   :  { %1047 = vmatpush1.bf16.msra.mxu0 %v1473_v37  ;;  %v1527_v9 = vld [vmem:[#allocation7 + $0x120] ss:$16 sps:$4 sm:$0xff]   ;;  %v1535_v11 = vld [vmem:[#allocation7 + $0x104] ss:$16 sps:$4 sm:$0xff]  }
  0x56   :  { %1088 = vmatpush1.bf16.msra.mxu1 %v1476_v38  ;;  %1048 = vmatprep.subr.bf16.mxu0 %v1481_v39  ;;  %v1530_v10 = vld [vmem:[#allocation7 + $0x320] ss:$16 sps:$4 sm:$0xff]   ;;  %v1538_v12 = vld [vmem:[#allocation7 + $0x304] ss:$16 sps:$4 sm:$0xff]  }
  0x57   :  { %1089 = vmatprep.subr.bf16.mxu1 %v1484_v40  ;;  %v1533_v13 = vld [vmem:[#allocation7 + $0x100] ss:$16 sps:$4 sm:$0xff]  }
  0x58   :  { %v1536_v14 = vld [vmem:[#allocation7 + $0x300] ss:$16 sps:$4 sm:$0xff]  }
  0x59   :  { %1049 = vmatpush1.bf16.msra.mxu0 %v1479_v41 }
  0x5a   :  { %1090 = vmatpush1.bf16.msra.mxu1 %v1482_v42  ;;  %1050 = vmatprep.subr.bf16.mxu0 %v1487_v43 }
  0x5b   :  { %1091 = vmatprep.subr.bf16.mxu1 %v1490_v44 }
  0x5d   :  { %1051 = vmatpush1.bf16.msra.mxu0 %v1485_v45 }
  0x5e   :  { %1092 = vmatpush1.bf16.msra.mxu1 %v1488_v46  ;;  %1052 = vmatprep.subr.bf16.mxu0 %v1493_v47  ;;  %v1539_v47 = vld [vmem:[#allocation7 + $0xe8] ss:$16 sps:$4 sm:$0xff]  }
  0x5f   :  { %1093 = vmatprep.subr.bf16.mxu1 %v1496_v48  ;;  %v1542_v48 = vld [vmem:[#allocation7 + $0x2e8] ss:$16 sps:$4 sm:$0xff]  }
  0x61   :  { %1053 = vmatpush2.bf16.msra.mxu0 %v1491_v49 }
  0x62   :  { %1094 = vmatpush2.bf16.msra.mxu1 %v1494_v50  ;;  %1054 = vmatprep.subr.bf16.mxu0 %v1499_v51  ;;  %v1547_v50 = vld [vmem:[#allocation7 + $0xcc] ss:$16 sps:$4 sm:$0xff]  }
  0x63   :  { %1095 = vmatprep.subr.bf16.mxu1 %v1502_v52  ;;  %v1550_v51 = vld [vmem:[#allocation7 + $0x2cc] ss:$16 sps:$4 sm:$0xff]   ;;  %v1545_v52 = vld [vmem:[#allocation7 + $0xc8] ss:$16 sps:$4 sm:$0xff]  }
  0x65   :  { %1055 = vmatpush2.bf16.msra.mxu0 %v1497_v53  ;;  %v1548_v53 = vld [vmem:[#allocation7 + $0x2c8] ss:$16 sps:$4 sm:$0xff]  }
  0x66   :  { %1096 = vmatpush2.bf16.msra.mxu1 %v1500_v54  ;;  %1056 = vmatprep.subr.bf16.mxu0 %v1505_v55  ;;  %v1553_v54 = vld [vmem:[#allocation7 + $0xac] ss:$16 sps:$4 sm:$0xff]  }
  0x67   :  { %1097 = vmatprep.subr.bf16.mxu1 %v1508_v56  ;;  %v1556_v55 = vld [vmem:[#allocation7 + $0x2ac] ss:$16 sps:$4 sm:$0xff]   ;;  %v1551_v56 = vld [vmem:[#allocation7 + $0xa8] ss:$16 sps:$4 sm:$0xff]  }
  0x69   :  { %1057 = vmatpush2.bf16.msra.mxu0 %v1503_v57  ;;  %v1554_v57 = vld [vmem:[#allocation7 + $0x2a8] ss:$16 sps:$4 sm:$0xff]  }
  0x6a   :  { %1098 = vmatpush2.bf16.msra.mxu1 %v1506_v58  ;;  %1058 = vmatprep.subr.bf16.mxu0 %v1511_v59  ;;  %v1559_v58 = vld [vmem:[#allocation7 + $0x8c] ss:$16 sps:$4 sm:$0xff]  }
  0x6b   :  { %1099 = vmatprep.subr.bf16.mxu1 %v1514_v60  ;;  %v1562_v59 = vld [vmem:[#allocation7 + $0x28c] ss:$16 sps:$4 sm:$0xff]   ;;  %v1557_v60 = vld [vmem:[#allocation7 + $0x88] ss:$16 sps:$4 sm:$0xff]  }
  0x6d   :  { %1059 = vmatpush2.bf16.msra.mxu0 %v1509_v61  ;;  %v1560_v61 = vld [vmem:[#allocation7 + $0x288] ss:$16 sps:$4 sm:$0xff]  }
  0x6e   :  { %1100 = vmatpush2.bf16.msra.mxu1 %v1512_v62  ;;  %1060 = vmatprep.subr.bf16.mxu0 %v1517_v63  ;;  %v1565_v62 = vld [vmem:[#allocation7 + $0x6c] ss:$16 sps:$4 sm:$0xff]  }
  0x6f   :  { %1101 = vmatprep.subr.bf16.mxu1 %v1520_v0  ;;  %v1568_v63 = vld [vmem:[#allocation7 + $0x26c] ss:$16 sps:$4 sm:$0xff]   ;;  %v1563_v0 = vld [vmem:[#allocation7 + $0x68] ss:$16 sps:$4 sm:$0xff]  }
  0x71   :  { %1061 = vmatpush2.bf16.msra.mxu0 %v1515_v1  ;;  %v1566_v1 = vld [vmem:[#allocation7 + $0x268] ss:$16 sps:$4 sm:$0xff]  }
  0x72   :  { %1102 = vmatpush2.bf16.msra.mxu1 %v1518_v2  ;;  %1062 = vmatprep.subr.bf16.mxu0 %v1523_v3  ;;  %v1571_v2 = vld [vmem:[#allocation7 + $0x4c] ss:$16 sps:$4 sm:$0xff]  }
  0x73   :  { %1103 = vmatprep.subr.bf16.mxu1 %v1526_v4  ;;  %v1574_v3 = vld [vmem:[#allocation7 + $0x24c] ss:$16 sps:$4 sm:$0xff]   ;;  %v1569_v4 = vld [vmem:[#allocation7 + $0x48] ss:$16 sps:$4 sm:$0xff]  }
  0x75   :  { %1063 = vmatpush2.bf16.msra.mxu0 %v1521_v5  ;;  %v1572_v5 = vld [vmem:[#allocation7 + $0x248] ss:$16 sps:$4 sm:$0xff]  }
  0x76   :  { %1104 = vmatpush2.bf16.msra.mxu1 %v1524_v6  ;;  %1064 = vmatprep.subr.bf16.mxu0 %v1529_v7  ;;  %v1577_v6 = vld [vmem:[#allocation7 + $0x2c] ss:$16 sps:$4 sm:$0xff]  }
  0x77   :  { %1105 = vmatprep.subr.bf16.mxu1 %v1532_v8  ;;  %v1580_v7 = vld [vmem:[#allocation7 + $0x22c] ss:$16 sps:$4 sm:$0xff]   ;;  %v1575_v8 = vld [vmem:[#allocation7 + $0x28] ss:$16 sps:$4 sm:$0xff]  }
  0x79   :  { %1065 = vmatpush2.bf16.msra.mxu0 %v1527_v9  ;;  %v1578_v9 = vld [vmem:[#allocation7 + $0x228] ss:$16 sps:$4 sm:$0xff]  }
  0x7a   :  { %1106 = vmatpush2.bf16.msra.mxu1 %v1530_v10  ;;  %1066 = vmatprep.subr.bf16.mxu0 %v1535_v11  ;;  %v1583_v10 = vld [vmem:[#allocation7 + $0xc] ss:$16 sps:$4 sm:$0xff]  }
  0x7b   :  { %1107 = vmatprep.subr.bf16.mxu1 %v1538_v12  ;;  %v1586_v11 = vld [vmem:[#allocation7 + $0x20c] ss:$16 sps:$4 sm:$0xff]   ;;  %v1581_v12 = vld [vmem:[#allocation7 + $0x8] ss:$16 sps:$4 sm:$0xff]  }
  0x7d   :  { %1067 = vmatpush2.bf16.msra.mxu0 %v1533_v13  ;;  %v1584_v13 = vld [vmem:[#allocation7 + $0x208] ss:$16 sps:$4 sm:$0xff]  }
  0x7e   :  { %1108 = vmatpush2.bf16.msra.mxu1 %v1536_v14  ;;  %1118 = vmatprep.subr.bf16.mxu0 %v1541_v15  ;;  %v1589_v14 = vld [vmem:[#allocation7 + $0x1ec] ss:$16 sps:$4 sm:$0xff]  }
  0x7f   :  { %1159 = vmatprep.subr.bf16.mxu1 %v1544_v16  ;;  %v1592_v15 = vld [vmem:[#allocation7 + $0x3ec] ss:$16 sps:$4 sm:$0xff]   ;;  %v1587_v16 = vld [vmem:[#allocation7 + $0x1e8] ss:$16 sps:$4 sm:$0xff]  }
 0x100   :  { %v190_v28 = vpop.f32.mrf.mxu0 }
 0x101   :  { %v231_v29 = vpop.f32.mrf.mxu1  ;;  %v191_v30 = vadd.f32 %v190_v28, %v92_v24  ;;  %v1598_v24 = vld [vmem:[#allocation7 + $0x3cc] ss:$16 sps:$4 sm:$0xff]  }
 0x102   :  { %v232_v31 = vadd.f32 %v231_v29, %v100_v25  ;;  %v192_v32 = vpop.f32.mrf.mxu0  ;;  %v1593_v25 = vld [vmem:[#allocation7 + $0x1c8] ss:$16 sps:$4 sm:$0xff]   ;;  %v1604_v28 = vld [vmem:[#allocation7 + $0x3ac] ss:$16 sps:$4 sm:$0xff]  }
 0x103   :  { %v233_v33 = vpop.f32.mrf.mxu1  ;;  %v193_v35 = vadd.f32 %v192_v32, %v96_v26  ;;  %v238_v37 = vmax.f32 %v191_v30, 0.0  ;;  %v1596_v26 = vld [vmem:[#allocation7 + $0x3c8] ss:$16 sps:$4 sm:$0xff]   ;;  %v1610_v32 = vld [vmem:[#allocation7 + $0x38c] ss:$16 sps:$4 sm:$0xff]  }
 0x104   :  { %v240_v34 = vmax.f32 %v232_v31, 0.0  ;;  %v234_v36 = vadd.f32 %v233_v33, %v104_v27  ;;  %v194_v38 = vpop.f32.mrf.mxu0  ;;  %v1601_v27 = vld [vmem:[#allocation7 + $0x1ac] ss:$16 sps:$4 sm:$0xff]   ;;  %v1599_v29 = vld [vmem:[#allocation7 + $0x1a8] ss:$16 sps:$4 sm:$0xff]  }
 0x105   :  { %v235_v39 = vpop.f32.mrf.mxu1  ;;  %v239_v40 = vmax.f32 %v193_v35, 0.0  ;;  %v1805_v49 = vpack.c.bf16 %v238_v37, %v238_v37  ;;  %v1602_v30 = vld [vmem:[#allocation7 + $0x3a8] ss:$16 sps:$4 sm:$0xff]   ;;  %v1607_v31 = vld [vmem:[#allocation7 + $0x18c] ss:$16 sps:$4 sm:$0xff]  }
 0x106   :  { %v241_v41 = vmax.f32 %v234_v36, 0.0  ;;  %v1803_v42 = vpack.c.bf16 %v240_v34, %v240_v34  ;;  %v195_v43 = vpop.f32.mrf.mxu0  ;;  %v1605_v33 = vld [vmem:[#allocation7 + $0x188] ss:$16 sps:$4 sm:$0xff]   ;;  %v1613_v35 = vld [vmem:[#allocation7 + $0x16c] ss:$16 sps:$4 sm:$0xff]  }
 0x107   :  { %v236_v44 = vpop.f32.mrf.mxu1  ;;  %v243_v45 = vpack.c.bf16 %v239_v40, %v239_v40  ;;  %v1608_v34 = vld [vmem:[#allocation7 + $0x388] ss:$16 sps:$4 sm:$0xff]   ;;  %v1616_v36 = vld [vmem:[#allocation7 + $0x36c] ss:$16 sps:$4 sm:$0xff]  }
 0x108   :  { %v245_v46 = vpack.c.bf16 %v241_v41, %v241_v41  ;;  %v1611_v37 = vld [vmem:[#allocation7 + $0x168] ss:$16 sps:$4 sm:$0xff]   ;;  %v1619_v39 = vld [vmem:[#allocation7 + $0x14c] ss:$16 sps:$4 sm:$0xff]  }
 0x109   :  { %1068 = vmatprep.mubr.bf16.mxu0 %v243_v45  ;;  %v1614_v38 = vld [vmem:[#allocation7 + $0x368] ss:$16 sps:$4 sm:$0xff]   ;;  %v1622_v40 = vld [vmem:[#allocation7 + $0x34c] ss:$16 sps:$4 sm:$0xff]  }
 0x10a   :  { %1109 = vmatprep.mubr.bf16.mxu1 %v245_v46  ;;  %1069 = vmatmul.mubr.bf16.vlgmr.msra.gmra.mxu0 %v1805_v49  ;;  %v1617_v41 = vld [vmem:[#allocation7 + $0x148] ss:$16 sps:$4 sm:$0xff]   ;;  %v1625_v44 = vld [vmem:[#allocation7 + $0x12c] ss:$16 sps:$4 sm:$0xff]  }
 0x10b   :  { %1110 = vmatmul.mubr.bf16.vlgmr.msra.gmra.mxu1 %v1803_v42  ;;  %1119 = vmatpush1.bf16.msra.mxu0 %v1539_v47  ;;  %v1620_v43 = vld [vmem:[#allocation7 + $0x348] ss:$16 sps:$4 sm:$0xff]  }
 0x10c   :  { %1160 = vmatpush1.bf16.msra.mxu1 %v1542_v48  ;;  %1150 = vmatprep.mubr.bf16.mxu0 %v243_v45  ;;  %v1628_v45 = vld [vmem:[#allocation7 + $0x32c] ss:$16 sps:$4 sm:$0xff]   ;;  %v1626_v47 = vld [vmem:[#allocation7 + $0x328] ss:$16 sps:$4 sm:$0xff]  }
 0x10d   :  { %1191 = vmatprep.mubr.bf16.mxu1 %v245_v46  ;;  %1120 = vmatprep.subr.bf16.mxu0 %v1547_v50  ;;  %v1623_v46 = vld [vmem:[#allocation7 + $0x128] ss:$16 sps:$4 sm:$0xff]   ;;  %v1631_v48 = vld [vmem:[#allocation7 + $0x10c] ss:$16 sps:$4 sm:$0xff]  }
 0x10e   :  { %1161 = vmatprep.subr.bf16.mxu1 %v1550_v51  ;;  %v1634_v50 = vld [vmem:[#allocation7 + $0x30c] ss:$16 sps:$4 sm:$0xff]   ;;  %v1629_v51 = vld [vmem:[#allocation7 + $0x108] ss:$16 sps:$4 sm:$0xff]  }
 0x10f   :  { %1121 = vmatpush1.bf16.msra.mxu0 %v1545_v52  ;;  %v1632_v52 = vld [vmem:[#allocation7 + $0x308] ss:$16 sps:$4 sm:$0xff]  }
 0x110   :  { %1162 = vmatpush1.bf16.msra.mxu1 %v1548_v53  ;;  %1122 = vmatprep.subr.bf16.mxu0 %v1553_v54 }
 0x111   :  { %1163 = vmatprep.subr.bf16.mxu1 %v1556_v55 }
 0x113   :  { %1123 = vmatpush1.bf16.msra.mxu0 %v1551_v56 }
 0x114   :  { %1164 = vmatpush1.bf16.msra.mxu1 %v1554_v57  ;;  %1124 = vmatprep.subr.bf16.mxu0 %v1559_v58 }
 0x115   :  { %1165 = vmatprep.subr.bf16.mxu1 %v1562_v59 }
 0x117   :  { %1125 = vmatpush1.bf16.msra.mxu0 %v1557_v60 }
 0x118   :  { %1166 = vmatpush1.bf16.msra.mxu1 %v1560_v61  ;;  %1126 = vmatprep.subr.bf16.mxu0 %v1565_v62  ;;  %v374_v61 = vld [vmem:[%s1830_s4] sm:$0xf] }
 0x119   :  { %1167 = vmatprep.subr.bf16.mxu1 %v1568_v63  ;;  %v383_v62 = vrot.slane %v374_v61, %v1795_v22  ;;  %v379_v63 = vrot.slane %v374_v61, %v1788_v19 }
 0x11b   :  { %1127 = vmatpush1.bf16.msra.mxu0 %v1563_v0 }
 0x11c   :  { %1168 = vmatpush1.bf16.msra.mxu1 %v1566_v1  ;;  %1128 = vmatprep.subr.bf16.mxu0 %v1571_v2  ;;  %v387_v2 = vrot.slane %v374_v61, %v1790_v20 }
 0x11d   :  { %1169 = vmatprep.subr.bf16.mxu1 %v1574_v3  ;;  %v1204_v3 = vld [vmem:[#allocation8] sm:$0xf] }
 0x11f   :  { %1129 = vmatpush1.bf16.msra.mxu0 %v1569_v4 }
 0x120   :  { %1170 = vmatpush1.bf16.msra.mxu1 %v1572_v5  ;;  %1130 = vmatprep.subr.bf16.mxu0 %v1577_v6  ;;  %v1213_v5 = vrot.slane %v1204_v3, %v1795_v22  ;;  %v391_v6 = vrot.slane %v374_v61, %v1797_v23 }
 0x121   :  { %1171 = vmatprep.subr.bf16.mxu1 %v1580_v7 }
 0x123   :  { %1131 = vmatpush1.bf16.msra.mxu0 %v1575_v8 }
 0x124   :  { %1172 = vmatpush1.bf16.msra.mxu1 %v1578_v9  ;;  %1132 = vmatprep.subr.bf16.mxu0 %v1583_v10  ;;  %v1209_v10 = vrot.slane %v1204_v3, %v1788_v19 }
 0x125   :  { %1173 = vmatprep.subr.bf16.mxu1 %v1586_v11 }
 0x127   :  { %1133 = vmatpush1.bf16.msra.mxu0 %v1581_v12 }
 0x128   :  { %1174 = vmatpush1.bf16.msra.mxu1 %v1584_v13  ;;  %1134 = vmatprep.subr.bf16.mxu0 %v1589_v14 }
 0x129   :  { %1175 = vmatprep.subr.bf16.mxu1 %v1592_v15 }
 0x12b   :  { %1135 = vmatpush2.bf16.msra.mxu0 %v1587_v16  ;;  %v1217_v16 = vrot.slane %v1204_v3, %v1790_v20 }
 0x12c   :  { %1176 = vmatpush2.bf16.msra.mxu1 %v1590_v18  ;;  %1136 = vmatprep.subr.bf16.mxu0 %v1595_v21 }
 0x12d   :  { %1177 = vmatprep.subr.bf16.mxu1 %v1598_v24 }
 0x12f   :  { %1137 = vmatpush2.bf16.msra.mxu0 %v1593_v25 }
 0x130   :  { %1178 = vmatpush2.bf16.msra.mxu1 %v1596_v26  ;;  %1138 = vmatprep.subr.bf16.mxu0 %v1601_v27  ;;  %v1221_v27 = vrot.slane %v1204_v3, %v1797_v23 }
 0x131   :  { %1179 = vmatprep.subr.bf16.mxu1 %v1604_v28 }
 0x133   :  { %1139 = vmatpush2.bf16.msra.mxu0 %v1599_v29 }
 0x134   :  { %1180 = vmatpush2.bf16.msra.mxu1 %v1602_v30  ;;  %1140 = vmatprep.subr.bf16.mxu0 %v1607_v31 }
 0x135   :  { %1181 = vmatprep.subr.bf16.mxu1 %v1610_v32 }
 0x137   :  { %1141 = vmatpush2.bf16.msra.mxu0 %v1605_v33 }
 0x138   :  { %1182 = vmatpush2.bf16.msra.mxu1 %v1608_v34  ;;  %1142 = vmatprep.subr.bf16.mxu0 %v1613_v35  ;;  %v1423_v35 = vld [vmem:[#allocation2] ss:$0 sm:$0xff] }
 0x139   :  { %1183 = vmatprep.subr.bf16.mxu1 %v1616_v36 }
 0x13b   :  { %1143 = vmatpush2.bf16.msra.mxu0 %v1611_v37 }
 0x13c   :  { %1184 = vmatpush2.bf16.msra.mxu1 %v1614_v38  ;;  %1144 = vmatprep.subr.bf16.mxu0 %v1619_v39 }
 0x13d   :  { %1185 = vmatprep.subr.bf16.mxu1 %v1622_v40 }
 0x13f   :  { %1145 = vmatpush2.bf16.msra.mxu0 %v1617_v41 }
 0x140   :  { %1186 = vmatpush2.bf16.msra.mxu1 %v1620_v43  ;;  %1146 = vmatprep.subr.bf16.mxu0 %v1625_v44 }
 0x141   :  { %1187 = vmatprep.subr.bf16.mxu1 %v1628_v45 }
 0x143   :  { %1147 = vmatpush2.bf16.msra.mxu0 %v1623_v46 }
 0x144   :  { %1188 = vmatpush2.bf16.msra.mxu1 %v1626_v47  ;;  %1148 = vmatprep.subr.bf16.mxu0 %v1631_v48 }
 0x145   :  { %1189 = vmatprep.subr.bf16.mxu1 %v1634_v50 }
 0x147   :  { %1149 = vmatpush2.bf16.msra.mxu0 %v1629_v51 }
 0x148   :  { %1190 = vmatpush2.bf16.msra.mxu1 %v1632_v52 }
 0x14a   :  { %1151 = vmatmul.mubr.bf16.vlgmr.msra.gmra.mxu0 %v1805_v49 }
 0x14b   :  { %1192 = vmatmul.mubr.bf16.vlgmr.msra.gmra.mxu1 %v1803_v42 }
 0x1ca   :  { %v1070_v53 = vpop.f32.mrf.mxu0 }
 0x1cb   :  { %v1111_v54 = vpop.f32.mrf.mxu1  ;;  %v1071_v49 = vadd.f32 %v1070_v53, %v379_v63 }
 0x1cc   :  { %v1072_v55 = vpop.f32.mrf.mxu0 }
 0x1cd   :  { %v1113_v56 = vpop.f32.mrf.mxu1  ;;  %v1073_v0 = vadd.f32 %v1072_v55, %v383_v62  ;;  %v1112_v42 = vadd.f32 %v1111_v54, %v1071_v49  ;;  %v1259_v54 = vand.u32 127, %v89_v17 }
 0x1ce   :  { %v1074_v57 = vpop.f32.mrf.mxu0 }
 0x1cf   :  { %v1115_v58 = vpop.f32.mrf.mxu1  ;;  %v1114_v1 = vadd.f32 %v1113_v56, %v1073_v0  ;;  %v1200_v9 = vmax.f32 %v1112_v42, 0.0  ;;  %vm1260_vm3 = vcmp.eq.s32.totalorder %v1259_v54, 0 }
 0x1d0   :  { %v1075_v59 = vpop.f32.mrf.mxu0 }
 0x1d1   :  { %v1116_v60 = vpop.f32.mrf.mxu1  ;;  %v1201_v4 = vmax.f32 %v1114_v1, 0.0  ;;  %v1226_v25 = vmul.f32 %v1209_v10, %v1200_v9 }
 0x1d3   :  { %v1227_v14 = vmul.f32 %v1213_v5, %v1201_v4 }
 0x1d5   :  { %v1230_v19 = vadd.f32 %v1227_v14, %v1226_v25 }
 0x20a   :  { %v1152_v7 = vpop.f32.mrf.mxu0 }
 0x20b   :  { %v1193_v8 = vpop.f32.mrf.mxu1  ;;  %v1153_v11 = vadd.f32 %v1152_v7, %v387_v2 }
 0x20c   :  { %v1154_v12 = vpop.f32.mrf.mxu0 }
 0x20d   :  { %v1195_v13 = vpop.f32.mrf.mxu1  ;;  %v1194_v15 = vadd.f32 %v1193_v8, %v1153_v11  ;;  %v1155_v18 = vadd.f32 %v1154_v12, %v391_v6 }
 0x20e   :  { %v1156_v21 = vpop.f32.mrf.mxu0 }
 0x20f   :  { %v1197_v24 = vpop.f32.mrf.mxu1  ;;  %v1202_v26 = vmax.f32 %v1194_v15, 0.0  ;;  %v1196_v22 = vadd.f32 %v1195_v13, %v1155_v18 }
 0x210   :  { %v1157_v28 = vpop.f32.mrf.mxu0 }
 0x211   :  { %v1198_v29 = vpop.f32.mrf.mxu1  ;;  %v1228_v30 = vmul.f32 %v1217_v16, %v1202_v26  ;;  %v1203_v31 = vmax.f32 %v1196_v22, 0.0 }
 0x213   :  { %v1229_v32 = vmul.f32 %v1221_v27, %v1203_v31  ;;  %v1231_v33 = vadd.f32 %v1230_v19, %v1228_v30 }
 0x215   :  { %v1232_v34 = vadd.f32 %v1231_v33, %v1229_v32 }
 0x217   :  { %1233 = vadd.xlane.f32.xlu0 %v1232_v34 }
 0x2a0   :  { %v1234_v36 = vpop.xlane.xlu0 %1233 }
 0x2a1   :  { %v1242_v20 = vadd.f32 %v1423_v35, %v1234_v36 }
 0x2a3   :  { %v1244_v37 = vand.u32 2147483647, %v1242_v20  ;;  %v1243_v48 = vmax.f32 %v1242_v20, 0.0 }
 0x2a5   :  { %v1245_v38 = vsub.f32 0.0, %v1244_v37 }
 0x2a7   :  { %v1246_v39 = vmul.f32 1.442695, %v1245_v38 }
 0x2a9   :  { %1635 = vpow2.f32 %v1246_v39 }
 0x2b6   :  { %v1636_v40 = vpop.eup %1635 }
 0x2b7   :  { %v1248_v41 = vadd.f32 1.0, %v1636_v40  ;;  %v1251_v23 = vmul.f32 -0.5, %v1636_v40  ;;  %v1254_v44 = vand.u32 2147483647, %v1636_v40 }
 0x2b9   :  { %1637 = vlog2.f32 %v1248_v41  ;;  %v1252_v43 = vadd.f32 1.0, %v1251_v23  ;;  %vm1255_vm2 = vcmp.lt.f32.partialorder %v1254_v44, 0.0004427343 }
 0x2bb   :  { %v1253_v47 = vmul.f32 %v1636_v40, %v1252_v43 }
 0x2c6   :  { %v1638_v45 = vpop.eup %1637 }
 0x2c7   :  { %v1250_v46 = vmul.f32 0.6931472, %v1638_v45 }
 0x2c9   :  { %v1256_v50 = vsel %vm1255_vm2, %v1253_v47, %v1250_v46 }
 0x2ca   :  { %v1257_v51 = vadd.f32 %v1256_v50, %v1243_v48 }
 0x2cc   :  { %v1262_v52 = vsub.f32 %v1242_v20, %v1257_v51  ;;  %v1261_v53 = vsub.f32 0.0, %v1257_v51 }
 0x2ce   :  { %1270 = vperm.xlu1 %1432, %v1262_v52   ;;  %1265 = vperm.xlu0 %1431, %v1261_v53  }
 0x349   :  { %v1271_v55 = vpop.permute.xlu1 %1270  ;;  %v1266_v56 = vpop.permute.xlu0 %1265 }
 0x34a   :  { %v1273_v57 = vsel %vm1260_vm3, %v1266_v56, %v1271_v55 }
 0x34b   :  { %1275 = vst.msk [vmem:[%s1833_s7] sm:$0xff] %vm1274_vm4, %v1273_v57 }
 0x34c   :  { %1280 = vsyncpa [#allocation4], 1 }
 0x34d   :  { %1281 = vsyncpa [#allocation6], 1 }
 0x34e   :  { %1282 = vsyncpa [#allocation9], 1 }

</bundles_post_ra>
